<compile_context>
chip_gen: v7x
topology: tpu7x:2x2x1
jax: 0.10.0
libtpu: 0.0.40
codegen_flags: <defaults>
</compile_context>

<pallas_src>
import functools
import math

import jax
import jax.numpy as jnp
from jax.experimental import pallas as pl
from jax.experimental.pallas import tpu as pltpu


def _layer_norm(x, gamma, beta, eps):
    mean = jnp.mean(x, axis=-1, keepdims=True)
    var = jnp.mean((x - mean) ** 2, axis=-1, keepdims=True)
    return (x - mean) * jax.lax.rsqrt(var + eps) * gamma + beta


def encoder_stack_kernel(x_ref, bias_ref,
                         wqkv_ref, bqkv_ref,
                         wo_ref, bo_ref,
                         ln1g_ref, ln1b_ref,
                         w1_ref, b1_ref, w2_ref, b2_ref,
                         ln2g_ref, ln2b_ref,
                         out_ref, *, n_head, eps):
    l = pl.program_id(1)

    # Layer 0 of each batch row: seed the resident output block with the input
    # activation; all layers read/modify/write the output block in place.
    @pl.when(l == 0)
    def _():
        out_ref[...] = x_ref[...]

    x = out_ref[...]                                   # (S, D) float32
    S, D = x.shape
    dh = D // n_head
    scale = 1.0 / math.sqrt(dh)

    bias = bias_ref[...]                               # (1, S): 0 valid / -1e9 pad
    xb = x.astype(jnp.bfloat16)

    # ---- fused Q/K/V projection: one (S,D) x (D,3D) MXU matmul --------------
    qkv = jnp.dot(xb, wqkv_ref[...],
                  preferred_element_type=jnp.float32) + bqkv_ref[...]   # (S, 3D)

    # ---- per-head attention (scores/ctx are inherently K=dh matmuls) --------
    ctx_heads = []
    for h in range(n_head):
        q_h = (qkv[:, h * dh:(h + 1) * dh] * scale).astype(jnp.bfloat16)
        k_h = qkv[:, D + h * dh:D + (h + 1) * dh].astype(jnp.bfloat16)
        v_h = qkv[:, 2 * D + h * dh:2 * D + (h + 1) * dh].astype(jnp.bfloat16)

        # scores: q_h @ k_h^T via dot_general (no materialized transpose)
        s = jax.lax.dot_general(q_h, k_h, (((1,), (1,)), ((), ())),
                                preferred_element_type=jnp.float32) + bias
        s = s - jnp.max(s, axis=-1, keepdims=True)
        e = jnp.exp(s)
        denom = jnp.sum(e, axis=-1, keepdims=True)
        p = e * pl.reciprocal(denom, approx=True)      # ~8-bit accurate recip
        ctx_heads.append(jnp.dot(p.astype(jnp.bfloat16), v_h,
                                 preferred_element_type=jnp.float32))

    ctx = jnp.concatenate(ctx_heads, axis=-1)          # (S, H*dh) head-major

    # ---- head combine / output projection: single K=D contraction -----------
    attn = jnp.dot(ctx.astype(jnp.bfloat16), wo_ref[...],
                   preferred_element_type=jnp.float32) + bo_ref[...]    # (S, D)

    h1 = _layer_norm(x + attn, ln1g_ref[...], ln1b_ref[...], eps)

    # ---- position-wise feed forward -----------------------------------------
    ff = jnp.dot(h1.astype(jnp.bfloat16), w1_ref[...],
                 preferred_element_type=jnp.float32) + b1_ref[...]
    ff = jnp.maximum(ff, 0.0)
    ff = jnp.dot(ff.astype(jnp.bfloat16), w2_ref[...],
                 preferred_element_type=jnp.float32) + b2_ref[...]

    out_ref[...] = _layer_norm(h1 + ff, ln2g_ref[...], ln2b_ref[...], eps)


def encoder_forward(x, padding_mask, params, *, n_head, eps=1e-5):
    """x: (B, S, D) f32; padding_mask: (B, S), 1.0 = valid token, 0.0 = pad."""
    B, S, D = x.shape
    L = params["wqkv"].shape[0]
    d_ff = params["w1"].shape[2]

    # additive key-padding bias: 0 for valid, -1e9 for pad; shape (B, 1, S)
    bias = ((1.0 - padding_mask.astype(jnp.float32)) * -1e9)[:, None, :]

    kernel = functools.partial(encoder_stack_kernel, n_head=n_head, eps=eps)

    layer_keys = ("wqkv", "bqkv", "wo", "bo", "ln1g", "ln1b",
                  "w1", "b1", "w2", "b2", "ln2g", "ln2b")
    layer_params = [params[k] for k in layer_keys]

    def layer_spec(arr):
        nd = arr.ndim
        return pl.BlockSpec((None,) + tuple(arr.shape[1:]),
                            lambda b, l, _n=nd: (l,) + (0,) * (_n - 1))

    # ---- advisory cost estimate ---------------------------------------------
    flops = 2 * B * L * (S * D * 3 * D      # fused qkv projection
                         + 2 * S * S * D    # scores + context (summed over heads)
                         + S * D * D        # output projection
                         + 2 * S * D * d_ff)  # FFN
    transcendentals = B * L * (n_head * S * S + 2 * S)
    per_layer_w_bytes = sum(int(p.size) * p.dtype.itemsize
                            for p in layer_params) // L
    bytes_accessed = (B * L * per_layer_w_bytes          # weights re-streamed per row
                      + 2 * B * S * D * 4 + B * S * 4)   # x, out, mask
    cost = pl.CostEstimate(flops=flops, transcendentals=transcendentals,
                           bytes_accessed=bytes_accessed)

    # ---- explicit VMEM budget (double-buffered weights + act + temps) -------
    temps = (3 * S * D + n_head * S * S + S * d_ff + 4 * S * D) * 4
    vmem_needed = 2 * per_layer_w_bytes + 2 * (2 * S * D * 4 + S * 4) + temps
    vmem_limit = int(min(64 * 2 ** 20, max(32 * 2 ** 20, 2 * vmem_needed)))

    return pl.pallas_call(
        kernel,
        out_shape=jax.ShapeDtypeStruct((B, S, D), jnp.float32),
        grid=(B, L),
        in_specs=[
            pl.BlockSpec((None, S, D), lambda b, l: (b, 0, 0)),   # x
            pl.BlockSpec((None, 1, S), lambda b, l: (b, 0, 0)),   # key-pad bias
        ] + [layer_spec(p) for p in layer_params],
        out_specs=pl.BlockSpec((None, S, D), lambda b, l: (b, 0, 0)),
        compiler_params=pltpu.CompilerParams(
            dimension_semantics=("parallel", "arbitrary"),
            vmem_limit_bytes=vmem_limit),
        cost_estimate=cost,
    )(x, bias, *layer_params)


def init_encoder_params(key, n_layers, d_model, n_head, d_ff):
    std = 0.02
    f32 = jnp.float32
    ks = jax.random.split(key, 4)

    def w(k, shape):
        return (jax.random.normal(k, shape, f32) * std).astype(jnp.bfloat16)

    return dict(
        # fused qkv weight: columns = [q heads | k heads | v heads], head-major
        wqkv=w(ks[0], (n_layers, d_model, 3 * d_model)),
        bqkv=jnp.zeros((n_layers, 1, 3 * d_model), f32),
        # output projection: rows ordered head-major (h*dh + e)
        wo=w(ks[1], (n_layers, d_model, d_model)),
        bo=jnp.zeros((n_layers, 1, d_model), f32),
        ln1g=jnp.ones((n_layers, 1, d_model), f32),
        ln1b=jnp.zeros((n_layers, 1, d_model), f32),
        w1=w(ks[2], (n_layers, d_model, d_ff)),
        b1=jnp.zeros((n_layers, 1, d_ff), f32),
        w2=w(ks[3], (n_layers, d_ff, d_model)),
        b2=jnp.zeros((n_layers, 1, d_model), f32),
        ln2g=jnp.ones((n_layers, 1, d_model), f32),
        ln2b=jnp.zeros((n_layers, 1, d_model), f32),
    )


if __name__ == "__main__":
    N_encodinglayer = 2
    d_model = 32
    n_head = 4
    d_ff = 4 * d_model
    B, S = 2, 8

    root = jax.random.PRNGKey(0)
    kx, kp = jax.random.split(root)
    x = jax.random.normal(kx, (B, S, d_model), jnp.float32)
    # batch 0: all tokens valid; batch 1: last 3 positions are padding
    padding_mask = jnp.array(
        [[1] * S,
         [1] * (S - 3) + [0] * 3], dtype=jnp.float32)

    params = init_encoder_params(kp, N_encodinglayer, d_model, n_head, d_ff)

    y = encoder_forward(x, padding_mask, params, n_head=n_head, eps=1e-5)
    y = jax.block_until_ready(y)
    assert y.shape == (B, S, d_model)
    assert bool(jnp.all(jnp.isfinite(y)))
    print("KERNEL_OK")
</pallas_src>

<mosaic_0001>
module attributes {stable_mosaic.version = 11 : i64} {
  func.func @encoder_stack_kernel(%arg0: i32, %arg1: i32, %arg2: memref<1x8x32xf32, #tpu.memory_space<vmem>>, %arg3: memref<1x1x8xf32, #tpu.memory_space<vmem>>, %arg4: memref<1x32x96xbf16, #tpu.memory_space<vmem>>, %arg5: memref<1x1x96xf32, #tpu.memory_space<vmem>>, %arg6: memref<1x32x32xbf16, #tpu.memory_space<vmem>>, %arg7: memref<1x1x32xf32, #tpu.memory_space<vmem>>, %arg8: memref<1x1x32xf32, #tpu.memory_space<vmem>>, %arg9: memref<1x1x32xf32, #tpu.memory_space<vmem>>, %arg10: memref<1x32x128xbf16, #tpu.memory_space<vmem>>, %arg11: memref<1x1x128xf32, #tpu.memory_space<vmem>>, %arg12: memref<1x128x32xbf16, #tpu.memory_space<vmem>>, %arg13: memref<1x1x32xf32, #tpu.memory_space<vmem>>, %arg14: memref<1x1x32xf32, #tpu.memory_space<vmem>>, %arg15: memref<1x1x32xf32, #tpu.memory_space<vmem>>, %arg16: memref<1x8x32xf32, #tpu.memory_space<vmem>>) attributes {dimension_semantics = [#tpu.dimension_semantics<parallel>, #tpu.dimension_semantics<arbitrary>], iteration_bounds = array<i64: 2, 2>, scalar_prefetch = 0 : i64, scratch_operands = 0 : i64, tpu.core_type = #tpu.core_type<tc>, window_params = [{transform_indices = @transform_0, window_bounds = array<i64: 1, 8, 32>}, {transform_indices = @transform_1, window_bounds = array<i64: 1, 1, 8>}, {transform_indices = @transform_2, window_bounds = array<i64: 1, 32, 96>}, {transform_indices = @transform_3, window_bounds = array<i64: 1, 1, 96>}, {transform_indices = @transform_4, window_bounds = array<i64: 1, 32, 32>}, {transform_indices = @transform_5, window_bounds = array<i64: 1, 1, 32>}, {transform_indices = @transform_6, window_bounds = array<i64: 1, 1, 32>}, {transform_indices = @transform_7, window_bounds = array<i64: 1, 1, 32>}, {transform_indices = @transform_8, window_bounds = array<i64: 1, 32, 128>}, {transform_indices = @transform_9, window_bounds = array<i64: 1, 1, 128>}, {transform_indices = @transform_10, window_bounds = array<i64: 1, 128, 32>}, {transform_indices = @transform_11, window_bounds = array<i64: 1, 1, 32>}, {transform_indices = @transform_12, window_bounds = array<i64: 1, 1, 32>}, {transform_indices = @transform_13, window_bounds = array<i64: 1, 1, 32>}, {transform_indices = @transform_14, window_bounds = array<i64: 1, 8, 32>}]} {
    %c0_i32 = arith.constant 0 : i32
    %0 = arith.cmpi eq, %arg1, %c0_i32 : i32
    %1 = arith.extui %0 : i1 to i32
    %c0_i32_0 = arith.constant 0 : i32
    %2 = arith.cmpi ne, %1, %c0_i32_0 : i32
    scf.if %2 {
      %c0_79 = arith.constant 0 : index
      %c0_80 = arith.constant 0 : index
      %c0_81 = arith.constant 0 : index
      %191 = vector.load %arg2[%c0_79, %c0_80, %c0_81] : memref<1x8x32xf32, #tpu.memory_space<vmem>>, vector<1x8x32xf32>
      %192 = vector.shape_cast %191 : vector<1x8x32xf32> to vector<8x32xf32>
      %c0_82 = arith.constant 0 : index
      %c0_83 = arith.constant 0 : index
      %c0_84 = arith.constant 0 : index
      %193 = vector.load %arg16[%c0_82, %c0_83, %c0_84] : memref<1x8x32xf32, #tpu.memory_space<vmem>>, vector<1x8x32xf32>
      %194 = vector.shape_cast %193 : vector<1x8x32xf32> to vector<8x32xf32>
      %195 = vector.shape_cast %192 : vector<8x32xf32> to vector<1x8x32xf32>
      tpu.vector_store %arg16[%c0_82, %c0_83, %c0_84], %195 {strides = array<i32>} : memref<1x8x32xf32, #tpu.memory_space<vmem>>, vector<1x8x32xf32>,
    } else {
    }
    %c0 = arith.constant 0 : index
    %c0_1 = arith.constant 0 : index
    %c0_2 = arith.constant 0 : index
    %3 = vector.load %arg16[%c0, %c0_1, %c0_2] : memref<1x8x32xf32, #tpu.memory_space<vmem>>, vector<1x8x32xf32>
    %4 = vector.shape_cast %3 : vector<1x8x32xf32> to vector<8x32xf32>
    %c0_3 = arith.constant 0 : index
    %c0_4 = arith.constant 0 : index
    %c0_5 = arith.constant 0 : index
    %5 = vector.load %arg3[%c0_3, %c0_4, %c0_5] : memref<1x1x8xf32, #tpu.memory_space<vmem>>, vector<1x1x8xf32>
    %6 = vector.shape_cast %5 : vector<1x1x8xf32> to vector<1x8xf32>
    %7 = arith.truncf %4 : vector<8x32xf32> to vector<8x32xbf16>
    %c0_6 = arith.constant 0 : index
    %c0_7 = arith.constant 0 : index
    %c0_8 = arith.constant 0 : index
    %8 = vector.load %arg4[%c0_6, %c0_7, %c0_8] : memref<1x32x96xbf16, #tpu.memory_space<vmem>>, vector<1x32x96xbf16>
    %9 = vector.shape_cast %8 : vector<1x32x96xbf16> to vector<32x96xbf16>
    %cst = arith.constant dense<0.000000e+00> : vector<8x96xf32>
    %10 = tpu.matmul %7, %9, %cst {dimension_numbers = #tpu.dot_dimension_numbers<[1], [0], [0], [1], [0, 0, 1, 1], [], []>} : vector<8x32xbf16>, vector<32x96xbf16>, vector<8x96xf32> -> vector<8x96xf32>
    %c0_9 = arith.constant 0 : index
    %c0_10 = arith.constant 0 : index
    %c0_11 = arith.constant 0 : index
    %11 = vector.load %arg5[%c0_9, %c0_10, %c0_11] : memref<1x1x96xf32, #tpu.memory_space<vmem>>, vector<1x1x96xf32>
    %12 = vector.shape_cast %11 : vector<1x1x96xf32> to vector<1x96xf32>
    %13 = vector.broadcast %12 : vector<1x96xf32> to vector<8x96xf32>
    %14 = arith.addf %10, %13 : vector<8x96xf32>
    %15 = vector.extract_strided_slice %14 {offsets = [0, 0], sizes = [8, 8], strides = [1, 1]} : vector<8x96xf32> to vector<8x8xf32>
    %cst_12 = arith.constant 0.353553385 : f32
    %16 = vector.broadcast %cst_12 : f32 to vector<8x8xf32>
    %17 = arith.mulf %15, %16 : vector<8x8xf32>
    %18 = arith.truncf %17 : vector<8x8xf32> to vector<8x8xbf16>
    %19 = vector.extract_strided_slice %14 {offsets = [0, 32], sizes = [8, 8], strides = [1, 1]} : vector<8x96xf32> to vector<8x8xf32>
    %20 = arith.truncf %19 : vector<8x8xf32> to vector<8x8xbf16>
    %21 = vector.extract_strided_slice %14 {offsets = [0, 64], sizes = [8, 8], strides = [1, 1]} : vector<8x96xf32> to vector<8x8xf32>
    %22 = arith.truncf %21 : vector<8x8xf32> to vector<8x8xbf16>
    %cst_13 = arith.constant dense<0.000000e+00> : vector<8x8xf32>
    %23 = tpu.matmul %18, %20, %cst_13 {dimension_numbers = #tpu.dot_dimension_numbers<[1], [1], [0], [0], [0, 0, 1, 0], [], []>} : vector<8x8xbf16>, vector<8x8xbf16>, vector<8x8xf32> -> vector<8x8xf32>
    %24 = vector.broadcast %6 : vector<1x8xf32> to vector<8x8xf32>
    %25 = arith.addf %23, %24 : vector<8x8xf32>
    %cst_14 = arith.constant dense<0xFF800000> : vector<8xf32>
    %26 = vector.multi_reduction <maximumf>, %25, %cst_14 [1] : vector<8x8xf32> to vector<8xf32>
    %27 = vector.shape_cast %26 : vector<8xf32> to vector<8x1xf32>
    %28 = vector.broadcast %27 : vector<8x1xf32> to vector<8x8xf32>
    %29 = arith.subf %25, %28 : vector<8x8xf32>
    %30 = math.exp %29 : vector<8x8xf32>
    %cst_15 = arith.constant dense<0.000000e+00> : vector<8xf32>
    %31 = vector.multi_reduction <add>, %30, %cst_15 [1] : vector<8x8xf32> to vector<8xf32>
    %32 = vector.shape_cast %31 : vector<8xf32> to vector<8x1xf32>
    %33 = tpu.reciprocal %32 {approx = true} : vector<8x1xf32> -> vector<8x1xf32>
    %34 = vector.broadcast %33 : vector<8x1xf32> to vector<8x8xf32>
    %35 = arith.mulf %30, %34 : vector<8x8xf32>
    %36 = arith.truncf %35 : vector<8x8xf32> to vector<8x8xbf16>
    %cst_16 = arith.constant dense<0.000000e+00> : vector<8x8xf32>
    %37 = tpu.matmul %36, %22, %cst_16 {dimension_numbers = #tpu.dot_dimension_numbers<[1], [0], [0], [1], [0, 0, 1, 1], [], []>} : vector<8x8xbf16>, vector<8x8xbf16>, vector<8x8xf32> -> vector<8x8xf32>
    %38 = vector.extract_strided_slice %14 {offsets = [0, 8], sizes = [8, 8], strides = [1, 1]} : vector<8x96xf32> to vector<8x8xf32>
    %cst_17 = arith.constant 0.353553385 : f32
    %39 = vector.broadcast %cst_17 : f32 to vector<8x8xf32>
    %40 = arith.mulf %38, %39 : vector<8x8xf32>
    %41 = arith.truncf %40 : vector<8x8xf32> to vector<8x8xbf16>
    %42 = vector.extract_strided_slice %14 {offsets = [0, 40], sizes = [8, 8], strides = [1, 1]} : vector<8x96xf32> to vector<8x8xf32>
    %43 = arith.truncf %42 : vector<8x8xf32> to vector<8x8xbf16>
    %44 = vector.extract_strided_slice %14 {offsets = [0, 72], sizes = [8, 8], strides = [1, 1]} : vector<8x96xf32> to vector<8x8xf32>
    %45 = arith.truncf %44 : vector<8x8xf32> to vector<8x8xbf16>
    %cst_18 = arith.constant dense<0.000000e+00> : vector<8x8xf32>
    %46 = tpu.matmul %41, %43, %cst_18 {dimension_numbers = #tpu.dot_dimension_numbers<[1], [1], [0], [0], [0, 0, 1, 0], [], []>} : vector<8x8xbf16>, vector<8x8xbf16>, vector<8x8xf32> -> vector<8x8xf32>
    %47 = vector.broadcast %6 : vector<1x8xf32> to vector<8x8xf32>
    %48 = arith.addf %46, %47 : vector<8x8xf32>
    %cst_19 = arith.constant dense<0xFF800000> : vector<8xf32>
    %49 = vector.multi_reduction <maximumf>, %48, %cst_19 [1] : vector<8x8xf32> to vector<8xf32>
    %50 = vector.shape_cast %49 : vector<8xf32> to vector<8x1xf32>
    %51 = vector.broadcast %50 : vector<8x1xf32> to vector<8x8xf32>
    %52 = arith.subf %48, %51 : vector<8x8xf32>
    %53 = math.exp %52 : vector<8x8xf32>
    %cst_20 = arith.constant dense<0.000000e+00> : vector<8xf32>
    %54 = vector.multi_reduction <add>, %53, %cst_20 [1] : vector<8x8xf32> to vector<8xf32>
    %55 = vector.shape_cast %54 : vector<8xf32> to vector<8x1xf32>
    %56 = tpu.reciprocal %55 {approx = true} : vector<8x1xf32> -> vector<8x1xf32>
    %57 = vector.broadcast %56 : vector<8x1xf32> to vector<8x8xf32>
    %58 = arith.mulf %53, %57 : vector<8x8xf32>
    %59 = arith.truncf %58 : vector<8x8xf32> to vector<8x8xbf16>
    %cst_21 = arith.constant dense<0.000000e+00> : vector<8x8xf32>
    %60 = tpu.matmul %59, %45, %cst_21 {dimension_numbers = #tpu.dot_dimension_numbers<[1], [0], [0], [1], [0, 0, 1, 1], [], []>} : vector<8x8xbf16>, vector<8x8xbf16>, vector<8x8xf32> -> vector<8x8xf32>
    %61 = vector.extract_strided_slice %14 {offsets = [0, 16], sizes = [8, 8], strides = [1, 1]} : vector<8x96xf32> to vector<8x8xf32>
    %cst_22 = arith.constant 0.353553385 : f32
    %62 = vector.broadcast %cst_22 : f32 to vector<8x8xf32>
    %63 = arith.mulf %61, %62 : vector<8x8xf32>
    %64 = arith.truncf %63 : vector<8x8xf32> to vector<8x8xbf16>
    %65 = vector.extract_strided_slice %14 {offsets = [0, 48], sizes = [8, 8], strides = [1, 1]} : vector<8x96xf32> to vector<8x8xf32>
    %66 = arith.truncf %65 : vector<8x8xf32> to vector<8x8xbf16>
    %67 = vector.extract_strided_slice %14 {offsets = [0, 80], sizes = [8, 8], strides = [1, 1]} : vector<8x96xf32> to vector<8x8xf32>
    %68 = arith.truncf %67 : vector<8x8xf32> to vector<8x8xbf16>
    %cst_23 = arith.constant dense<0.000000e+00> : vector<8x8xf32>
    %69 = tpu.matmul %64, %66, %cst_23 {dimension_numbers = #tpu.dot_dimension_numbers<[1], [1], [0], [0], [0, 0, 1, 0], [], []>} : vector<8x8xbf16>, vector<8x8xbf16>, vector<8x8xf32> -> vector<8x8xf32>
    %70 = vector.broadcast %6 : vector<1x8xf32> to vector<8x8xf32>
    %71 = arith.addf %69, %70 : vector<8x8xf32>
    %cst_24 = arith.constant dense<0xFF800000> : vector<8xf32>
    %72 = vector.multi_reduction <maximumf>, %71, %cst_24 [1] : vector<8x8xf32> to vector<8xf32>
    %73 = vector.shape_cast %72 : vector<8xf32> to vector<8x1xf32>
    %74 = vector.broadcast %73 : vector<8x1xf32> to vector<8x8xf32>
    %75 = arith.subf %71, %74 : vector<8x8xf32>
    %76 = math.exp %75 : vector<8x8xf32>
    %cst_25 = arith.constant dense<0.000000e+00> : vector<8xf32>
    %77 = vector.multi_reduction <add>, %76, %cst_25 [1] : vector<8x8xf32> to vector<8xf32>
    %78 = vector.shape_cast %77 : vector<8xf32> to vector<8x1xf32>
    %79 = tpu.reciprocal %78 {approx = true} : vector<8x1xf32> -> vector<8x1xf32>
    %80 = vector.broadcast %79 : vector<8x1xf32> to vector<8x8xf32>
    %81 = arith.mulf %76, %80 : vector<8x8xf32>
    %82 = arith.truncf %81 : vector<8x8xf32> to vector<8x8xbf16>
    %cst_26 = arith.constant dense<0.000000e+00> : vector<8x8xf32>
    %83 = tpu.matmul %82, %68, %cst_26 {dimension_numbers = #tpu.dot_dimension_numbers<[1], [0], [0], [1], [0, 0, 1, 1], [], []>} : vector<8x8xbf16>, vector<8x8xbf16>, vector<8x8xf32> -> vector<8x8xf32>
    %84 = vector.extract_strided_slice %14 {offsets = [0, 24], sizes = [8, 8], strides = [1, 1]} : vector<8x96xf32> to vector<8x8xf32>
    %cst_27 = arith.constant 0.353553385 : f32
    %85 = vector.broadcast %cst_27 : f32 to vector<8x8xf32>
    %86 = arith.mulf %84, %85 : vector<8x8xf32>
    %87 = arith.truncf %86 : vector<8x8xf32> to vector<8x8xbf16>
    %88 = vector.extract_strided_slice %14 {offsets = [0, 56], sizes = [8, 8], strides = [1, 1]} : vector<8x96xf32> to vector<8x8xf32>
    %89 = arith.truncf %88 : vector<8x8xf32> to vector<8x8xbf16>
    %90 = vector.extract_strided_slice %14 {offsets = [0, 88], sizes = [8, 8], strides = [1, 1]} : vector<8x96xf32> to vector<8x8xf32>
    %91 = arith.truncf %90 : vector<8x8xf32> to vector<8x8xbf16>
    %cst_28 = arith.constant dense<0.000000e+00> : vector<8x8xf32>
    %92 = tpu.matmul %87, %89, %cst_28 {dimension_numbers = #tpu.dot_dimension_numbers<[1], [1], [0], [0], [0, 0, 1, 0], [], []>} : vector<8x8xbf16>, vector<8x8xbf16>, vector<8x8xf32> -> vector<8x8xf32>
    %93 = vector.broadcast %6 : vector<1x8xf32> to vector<8x8xf32>
    %94 = arith.addf %92, %93 : vector<8x8xf32>
    %cst_29 = arith.constant dense<0xFF800000> : vector<8xf32>
    %95 = vector.multi_reduction <maximumf>, %94, %cst_29 [1] : vector<8x8xf32> to vector<8xf32>
    %96 = vector.shape_cast %95 : vector<8xf32> to vector<8x1xf32>
    %97 = vector.broadcast %96 : vector<8x1xf32> to vector<8x8xf32>
    %98 = arith.subf %94, %97 : vector<8x8xf32>
    %99 = math.exp %98 : vector<8x8xf32>
    %cst_30 = arith.constant dense<0.000000e+00> : vector<8xf32>
    %100 = vector.multi_reduction <add>, %99, %cst_30 [1] : vector<8x8xf32> to vector<8xf32>
    %101 = vector.shape_cast %100 : vector<8xf32> to vector<8x1xf32>
    %102 = tpu.reciprocal %101 {approx = true} : vector<8x1xf32> -> vector<8x1xf32>
    %103 = vector.broadcast %102 : vector<8x1xf32> to vector<8x8xf32>
    %104 = arith.mulf %99, %103 : vector<8x8xf32>
    %105 = arith.truncf %104 : vector<8x8xf32> to vector<8x8xbf16>
    %cst_31 = arith.constant dense<0.000000e+00> : vector<8x8xf32>
    %106 = tpu.matmul %105, %91, %cst_31 {dimension_numbers = #tpu.dot_dimension_numbers<[1], [0], [0], [1], [0, 0, 1, 1], [], []>} : vector<8x8xbf16>, vector<8x8xbf16>, vector<8x8xf32> -> vector<8x8xf32>
    %107 = tpu.concatenate %37, %60, %83, %106 in 1 : vector<8x8xf32>, vector<8x8xf32>, vector<8x8xf32>, vector<8x8xf32> -> vector<8x32xf32>
    %108 = arith.truncf %107 : vector<8x32xf32> to vector<8x32xbf16>
    %c0_32 = arith.constant 0 : index
    %c0_33 = arith.constant 0 : index
    %c0_34 = arith.constant 0 : index
    %109 = vector.load %arg6[%c0_32, %c0_33, %c0_34] : memref<1x32x32xbf16, #tpu.memory_space<vmem>>, vector<1x32x32xbf16>
    %110 = vector.shape_cast %109 : vector<1x32x32xbf16> to vector<32x32xbf16>
    %cst_35 = arith.constant dense<0.000000e+00> : vector<8x32xf32>
    %111 = tpu.matmul %108, %110, %cst_35 {dimension_numbers = #tpu.dot_dimension_numbers<[1], [0], [0], [1], [0, 0, 1, 1], [], []>} : vector<8x32xbf16>, vector<32x32xbf16>, vector<8x32xf32> -> vector<8x32xf32>
    %c0_36 = arith.constant 0 : index
    %c0_37 = arith.constant 0 : index
    %c0_38 = arith.constant 0 : index
    %112 = vector.load %arg7[%c0_36, %c0_37, %c0_38] : memref<1x1x32xf32, #tpu.memory_space<vmem>>, vector<1x1x32xf32>
    %113 = vector.shape_cast %112 : vector<1x1x32xf32> to vector<1x32xf32>
    %114 = vector.broadcast %113 : vector<1x32xf32> to vector<8x32xf32>
    %115 = arith.addf %111, %114 : vector<8x32xf32>
    %116 = arith.addf %4, %115 : vector<8x32xf32>
    %c0_39 = arith.constant 0 : index
    %c0_40 = arith.constant 0 : index
    %c0_41 = arith.constant 0 : index
    %117 = vector.load %arg8[%c0_39, %c0_40, %c0_41] : memref<1x1x32xf32, #tpu.memory_space<vmem>>, vector<1x1x32xf32>
    %118 = vector.shape_cast %117 : vector<1x1x32xf32> to vector<1x32xf32>
    %c0_42 = arith.constant 0 : index
    %c0_43 = arith.constant 0 : index
    %c0_44 = arith.constant 0 : index
    %119 = vector.load %arg9[%c0_42, %c0_43, %c0_44] : memref<1x1x32xf32, #tpu.memory_space<vmem>>, vector<1x1x32xf32>
    %120 = vector.shape_cast %119 : vector<1x1x32xf32> to vector<1x32xf32>
    %cst_45 = arith.constant dense<0.000000e+00> : vector<8xf32>
    %121 = vector.multi_reduction <add>, %116, %cst_45 [1] : vector<8x32xf32> to vector<8xf32>
    %122 = vector.shape_cast %121 : vector<8xf32> to vector<8x1xf32>
    %cst_46 = arith.constant 3.200000e+01 : f32
    %123 = vector.broadcast %cst_46 : f32 to vector<8x1xf32>
    %124 = arith.divf %122, %123 : vector<8x1xf32>
    %125 = vector.broadcast %124 : vector<8x1xf32> to vector<8x32xf32>
    %126 = arith.subf %116, %125 : vector<8x32xf32>
    %127 = arith.mulf %126, %126 : vector<8x32xf32>
    %cst_47 = arith.constant dense<0.000000e+00> : vector<8xf32>
    %128 = vector.multi_reduction <add>, %127, %cst_47 [1] : vector<8x32xf32> to vector<8xf32>
    %129 = vector.shape_cast %128 : vector<8xf32> to vector<8x1xf32>
    %cst_48 = arith.constant 3.200000e+01 : f32
    %130 = vector.broadcast %cst_48 : f32 to vector<8x1xf32>
    %131 = arith.divf %129, %130 : vector<8x1xf32>
    %132 = vector.broadcast %124 : vector<8x1xf32> to vector<8x32xf32>
    %133 = arith.subf %116, %132 : vector<8x32xf32>
    %cst_49 = arith.constant 9.99999974E-6 : f32
    %134 = vector.broadcast %cst_49 : f32 to vector<8x1xf32>
    %135 = arith.addf %131, %134 : vector<8x1xf32>
    %136 = math.rsqrt %135 : vector<8x1xf32>
    %137 = vector.broadcast %136 : vector<8x1xf32> to vector<8x32xf32>
    %138 = arith.mulf %133, %137 : vector<8x32xf32>
    %139 = vector.broadcast %118 : vector<1x32xf32> to vector<8x32xf32>
    %140 = arith.mulf %138, %139 : vector<8x32xf32>
    %141 = vector.broadcast %120 : vector<1x32xf32> to vector<8x32xf32>
    %142 = arith.addf %140, %141 : vector<8x32xf32>
    %143 = arith.truncf %142 : vector<8x32xf32> to vector<8x32xbf16>
    %c0_50 = arith.constant 0 : index
    %c0_51 = arith.constant 0 : index
    %c0_52 = arith.constant 0 : index
    %144 = vector.load %arg10[%c0_50, %c0_51, %c0_52] : memref<1x32x128xbf16, #tpu.memory_space<vmem>>, vector<1x32x128xbf16>
    %145 = vector.shape_cast %144 : vector<1x32x128xbf16> to vector<32x128xbf16>
    %cst_53 = arith.constant dense<0.000000e+00> : vector<8x128xf32>
    %146 = tpu.matmul %143, %145, %cst_53 {dimension_numbers = #tpu.dot_dimension_numbers<[1], [0], [0], [1], [0, 0, 1, 1], [], []>} : vector<8x32xbf16>, vector<32x128xbf16>, vector<8x128xf32> -> vector<8x128xf32>
    %c0_54 = arith.constant 0 : index
    %c0_55 = arith.constant 0 : index
    %c0_56 = arith.constant 0 : index
    %147 = vector.load %arg11[%c0_54, %c0_55, %c0_56] : memref<1x1x128xf32, #tpu.memory_space<vmem>>, vector<1x1x128xf32>
    %148 = vector.shape_cast %147 : vector<1x1x128xf32> to vector<1x128xf32>
    %149 = vector.broadcast %148 : vector<1x128xf32> to vector<8x128xf32>
    %150 = arith.addf %146, %149 : vector<8x128xf32>
    %cst_57 = arith.constant 0.000000e+00 : f32
    %151 = vector.broadcast %cst_57 : f32 to vector<8x128xf32>
    %152 = arith.maximumf %150, %151 : vector<8x128xf32>
    %153 = arith.truncf %152 : vector<8x128xf32> to vector<8x128xbf16>
    %c0_58 = arith.constant 0 : index
    %c0_59 = arith.constant 0 : index
    %c0_60 = arith.constant 0 : index
    %154 = vector.load %arg12[%c0_58, %c0_59, %c0_60] : memref<1x128x32xbf16, #tpu.memory_space<vmem>>, vector<1x128x32xbf16>
    %155 = vector.shape_cast %154 : vector<1x128x32xbf16> to vector<128x32xbf16>
    %cst_61 = arith.constant dense<0.000000e+00> : vector<8x32xf32>
    %156 = tpu.matmul %153, %155, %cst_61 {dimension_numbers = #tpu.dot_dimension_numbers<[1], [0], [0], [1], [0, 0, 1, 1], [], []>} : vector<8x128xbf16>, vector<128x32xbf16>, vector<8x32xf32> -> vector<8x32xf32>
    %c0_62 = arith.constant 0 : index
    %c0_63 = arith.constant 0 : index
    %c0_64 = arith.constant 0 : index
    %157 = vector.load %arg13[%c0_62, %c0_63, %c0_64] : memref<1x1x32xf32, #tpu.memory_space<vmem>>, vector<1x1x32xf32>
    %158 = vector.shape_cast %157 : vector<1x1x32xf32> to vector<1x32xf32>
    %159 = vector.broadcast %158 : vector<1x32xf32> to vector<8x32xf32>
    %160 = arith.addf %156, %159 : vector<8x32xf32>
    %161 = arith.addf %142, %160 : vector<8x32xf32>
    %c0_65 = arith.constant 0 : index
    %c0_66 = arith.constant 0 : index
    %c0_67 = arith.constant 0 : index
    %162 = vector.load %arg14[%c0_65, %c0_66, %c0_67] : memref<1x1x32xf32, #tpu.memory_space<vmem>>, vector<1x1x32xf32>
    %163 = vector.shape_cast %162 : vector<1x1x32xf32> to vector<1x32xf32>
    %c0_68 = arith.constant 0 : index
    %c0_69 = arith.constant 0 : index
    %c0_70 = arith.constant 0 : index
    %164 = vector.load %arg15[%c0_68, %c0_69, %c0_70] : memref<1x1x32xf32, #tpu.memory_space<vmem>>, vector<1x1x32xf32>
    %165 = vector.shape_cast %164 : vector<1x1x32xf32> to vector<1x32xf32>
    %cst_71 = arith.constant dense<0.000000e+00> : vector<8xf32>
    %166 = vector.multi_reduction <add>, %161, %cst_71 [1] : vector<8x32xf32> to vector<8xf32>
    %167 = vector.shape_cast %166 : vector<8xf32> to vector<8x1xf32>
    %cst_72 = arith.constant 3.200000e+01 : f32
    %168 = vector.broadcast %cst_72 : f32 to vector<8x1xf32>
    %169 = arith.divf %167, %168 : vector<8x1xf32>
    %170 = vector.broadcast %169 : vector<8x1xf32> to vector<8x32xf32>
    %171 = arith.subf %161, %170 : vector<8x32xf32>
    %172 = arith.mulf %171, %171 : vector<8x32xf32>
    %cst_73 = arith.constant dense<0.000000e+00> : vector<8xf32>
    %173 = vector.multi_reduction <add>, %172, %cst_73 [1] : vector<8x32xf32> to vector<8xf32>
    %174 = vector.shape_cast %173 : vector<8xf32> to vector<8x1xf32>
    %cst_74 = arith.constant 3.200000e+01 : f32
    %175 = vector.broadcast %cst_74 : f32 to vector<8x1xf32>
    %176 = arith.divf %174, %175 : vector<8x1xf32>
    %177 = vector.broadcast %169 : vector<8x1xf32> to vector<8x32xf32>
    %178 = arith.subf %161, %177 : vector<8x32xf32>
    %cst_75 = arith.constant 9.99999974E-6 : f32
    %179 = vector.broadcast %cst_75 : f32 to vector<8x1xf32>
    %180 = arith.addf %176, %179 : vector<8x1xf32>
    %181 = math.rsqrt %180 : vector<8x1xf32>
    %182 = vector.broadcast %181 : vector<8x1xf32> to vector<8x32xf32>
    %183 = arith.mulf %178, %182 : vector<8x32xf32>
    %184 = vector.broadcast %163 : vector<1x32xf32> to vector<8x32xf32>
    %185 = arith.mulf %183, %184 : vector<8x32xf32>
    %186 = vector.broadcast %165 : vector<1x32xf32> to vector<8x32xf32>
    %187 = arith.addf %185, %186 : vector<8x32xf32>
    %c0_76 = arith.constant 0 : index
    %c0_77 = arith.constant 0 : index
    %c0_78 = arith.constant 0 : index
    %188 = vector.load %arg16[%c0_76, %c0_77, %c0_78] : memref<1x8x32xf32, #tpu.memory_space<vmem>>, vector<1x8x32xf32>
    %189 = vector.shape_cast %188 : vector<1x8x32xf32> to vector<8x32xf32>
    %190 = vector.shape_cast %187 : vector<8x32xf32> to vector<1x8x32xf32>
    tpu.vector_store %arg16[%c0_76, %c0_77, %c0_78], %190 {strides = array<i32>} : memref<1x8x32xf32, #tpu.memory_space<vmem>>, vector<1x8x32xf32>,
    return
  }
  func.func @transform_0(%arg0: i32, %arg1: i32) -> (i32, i32, i32) {
    %c0_i32 = arith.constant 0 : i32
    %c0_i32_0 = arith.constant 0 : i32
    %c0_i32_1 = arith.constant 0 : i32
    return %arg0, %c0_i32, %c0_i32_0 : i32, i32, i32
  }
  func.func @transform_1(%arg0: i32, %arg1: i32) -> (i32, i32, i32) {
    %c0_i32 = arith.constant 0 : i32
    %c0_i32_0 = arith.constant 0 : i32
    %c0_i32_1 = arith.constant 0 : i32
    return %arg0, %c0_i32, %c0_i32_0 : i32, i32, i32
  }
  func.func @transform_2(%arg0: i32, %arg1: i32) -> (i32, i32, i32) {
    %c0_i32 = arith.constant 0 : i32
    %c0_i32_0 = arith.constant 0 : i32
    %c0_i32_1 = arith.constant 0 : i32
    return %arg1, %c0_i32, %c0_i32_0 : i32, i32, i32
  }
  func.func @transform_3(%arg0: i32, %arg1: i32) -> (i32, i32, i32) {
    %c0_i32 = arith.constant 0 : i32
    %c0_i32_0 = arith.constant 0 : i32
    %c0_i32_1 = arith.constant 0 : i32
    return %arg1, %c0_i32, %c0_i32_0 : i32, i32, i32
  }
  func.func @transform_4(%arg0: i32, %arg1: i32) -> (i32, i32, i32) {
    %c0_i32 = arith.constant 0 : i32
    %c0_i32_0 = arith.constant 0 : i32
    %c0_i32_1 = arith.constant 0 : i32
    return %arg1, %c0_i32, %c0_i32_0 : i32, i32, i32
  }
  func.func @transform_5(%arg0: i32, %arg1: i32) -> (i32, i32, i32) {
    %c0_i32 = arith.constant 0 : i32
    %c0_i32_0 = arith.constant 0 : i32
    %c0_i32_1 = arith.constant 0 : i32
    return %arg1, %c0_i32, %c0_i32_0 : i32, i32, i32
  }
  func.func @transform_6(%arg0: i32, %arg1: i32) -> (i32, i32, i32) {
    %c0_i32 = arith.constant 0 : i32
    %c0_i32_0 = arith.constant 0 : i32
    %c0_i32_1 = arith.constant 0 : i32
    return %arg1, %c0_i32, %c0_i32_0 : i32, i32, i32
  }
  func.func @transform_7(%arg0: i32, %arg1: i32) -> (i32, i32, i32) {
    %c0_i32 = arith.constant 0 : i32
    %c0_i32_0 = arith.constant 0 : i32
    %c0_i32_1 = arith.constant 0 : i32
    return %arg1, %c0_i32, %c0_i32_0 : i32, i32, i32
  }
  func.func @transform_8(%arg0: i32, %arg1: i32) -> (i32, i32, i32) {
    %c0_i32 = arith.constant 0 : i32
    %c0_i32_0 = arith.constant 0 : i32
    %c0_i32_1 = arith.constant 0 : i32
    return %arg1, %c0_i32, %c0_i32_0 : i32, i32, i32
  }
  func.func @transform_9(%arg0: i32, %arg1: i32) -> (i32, i32, i32) {
    %c0_i32 = arith.constant 0 : i32
    %c0_i32_0 = arith.constant 0 : i32
    %c0_i32_1 = arith.constant 0 : i32
    return %arg1, %c0_i32, %c0_i32_0 : i32, i32, i32
  }
  func.func @transform_10(%arg0: i32, %arg1: i32) -> (i32, i32, i32) {
    %c0_i32 = arith.constant 0 : i32
    %c0_i32_0 = arith.constant 0 : i32
    %c0_i32_1 = arith.constant 0 : i32
    return %arg1, %c0_i32, %c0_i32_0 : i32, i32, i32
  }
  func.func @transform_11(%arg0: i32, %arg1: i32) -> (i32, i32, i32) {
    %c0_i32 = arith.constant 0 : i32
    %c0_i32_0 = arith.constant 0 : i32
    %c0_i32_1 = arith.constant 0 : i32
    return %arg1, %c0_i32, %c0_i32_0 : i32, i32, i32
  }
  func.func @transform_12(%arg0: i32, %arg1: i32) -> (i32, i32, i32) {
    %c0_i32 = arith.constant 0 : i32
    %c0_i32_0 = arith.constant 0 : i32
    %c0_i32_1 = arith.constant 0 : i32
    return %arg1, %c0_i32, %c0_i32_0 : i32, i32, i32
  }
  func.func @transform_13(%arg0: i32, %arg1: i32) -> (i32, i32, i32) {
    %c0_i32 = arith.constant 0 : i32
    %c0_i32_0 = arith.constant 0 : i32
    %c0_i32_1 = arith.constant 0 : i32
    return %arg1, %c0_i32, %c0_i32_0 : i32, i32, i32
  }
  func.func @transform_14(%arg0: i32, %arg1: i32) -> (i32, i32, i32) {
    %c0_i32 = arith.constant 0 : i32
    %c0_i32_0 = arith.constant 0 : i32
    %c0_i32_1 = arith.constant 0 : i32
    return %arg0, %c0_i32, %c0_i32_0 : i32, i32, i32
  }
}

</mosaic_0001>

<bundles_post_ra>
// kernel: tpu_custom_call.1
= control target key start
LH: loop header
LB: loop body
LE: loop exit
PB: predicated region body
PF: predicated region fallthrough
CT: control target
= control target key end

     0   :  { %s2599_s0 = inlined_call_operand.vmem [shape: f32[2,8,32], index: 0, kind: input, shape index: {}]   ;;  %s2600_s1 = inlined_call_operand.vmem [shape: f32[2,1,8], index: 1, kind: input, shape index: {}]   ;;  %s2601_s2 = inlined_call_operand.vmem [shape: bf16[2,32,96], index: 2, kind: input, shape index: {}]   ;;  %s2602_s3 = inlined_call_operand.vmem [shape: f32[2,1,96], index: 3, kind: input, shape index: {}]   ;;  %s2603_s4 = inlined_call_operand.vmem [shape: bf16[2,32,32], index: 4, kind: input, shape index: {}]   ;;  %s2604_s5 = inlined_call_operand.vmem [shape: f32[2,1,32], index: 5, kind: input, shape index: {}]   ;;  %s2605_s6 = inlined_call_operand.vmem [shape: f32[2,1,32], index: 6, kind: input, shape index: {}]   ;;  %s2606_s7 = inlined_call_operand.vmem [shape: f32[2,1,32], index: 7, kind: input, shape index: {}]   ;;  %s2607_s8 = inlined_call_operand.vmem [shape: bf16[2,32,128], index: 8, kind: input, shape index: {}]   ;;  %s2608_s9 = inlined_call_operand.vmem [shape: f32[2,1,128], index: 9, kind: input, shape index: {}]   ;;  %s2609_s10 = inlined_call_operand.vmem [shape: bf16[2,128,32], index: 10, kind: input, shape index: {}]   ;;  %s2610_s11 = inlined_call_operand.vmem [shape: f32[2,1,32], index: 11, kind: input, shape index: {}]   ;;  %s2611_s12 = inlined_call_operand.vmem [shape: f32[2,1,32], index: 12, kind: input, shape index: {}]   ;;  %s2612_s13 = inlined_call_operand.vmem [shape: f32[2,1,32], index: 13, kind: input, shape index: {}]   ;;  %s2613_s14 = inlined_call_operand.hbm [shape: f32[2,8,32], index: 14, kind: output, shape index: {}]  }
   0x1   :  { %2629 = sst [smem:[#allocation18_spill]] %s2599_s0 }
   0x2   :  { %2630 = sst [smem:[#allocation19_spill]] %s2601_s2 }
   0x3   :  { %2631 = sst [smem:[#allocation20_spill]] %s2603_s4 }
   0x4   :  { %2632 = sst [smem:[#allocation21_spill]] %s2605_s6 }
   0x5   :  { %2633 = sst [smem:[#allocation22_spill]] %s2606_s7 }
   0x6   :  { %2634 = sst [smem:[#allocation23_spill]] %s2607_s8 }
   0x7   :  { %2635 = sst [smem:[#allocation24_spill]] %s2609_s10 }
   0x8   :  { %2636 = sst [smem:[#allocation25_spill]] %s2611_s12 }
   0x9   :  { %2637 = sst [smem:[#allocation26_spill]] %s2612_s13 }
   0xa   :  { %2638 = sst [smem:[#allocation27_spill]] %s2613_s14 }
   0xb   :  { %19 = vsyncpa [#allocation3], 0 }
   0xc   :  { %21 = vsyncpa [#allocation3 + $0x1], 0  ;;  %s2242_s29 = smov 0   ;;  %s2244_s30 = smov 0  }
   0xd   :  { %s2246_s15 = smov 0   ;;  %s2248_s16 = smov 0  }
   0xe   :  { %s2250_s17 = smov 0   ;;  %s2252_s18 = smov 0  }
   0xf   :  { %s2254_s19 = smov 0   ;;  %s2256_s20 = smov 0  }
  0x10 LB: > { %2639 = sst [smem:[#allocation5_spill]] %s2120_s29  ;;  %s1749_s21 = sadd.s32 4294967295, %s2148_s20   ;;  %s2148_s20 = sphi %s2256_s20, %s27_s20   ;;  %s2144_s19 = sphi %s2254_s19, %s2688_s19   ;;  %s2140_s18 = sphi %s2252_s18, %s2687_s18   ;;  %s2136_s17 = sphi %s2250_s17, %s2686_s17   ;;  %s2132_s16 = sphi %s2248_s16, %s2685_s16   ;;  %s2128_s15 = sphi %s2246_s15, %s2684_s15   ;;  %s2124_s30 = sphi %s2244_s30, %s2683_s30   ;;  %s2120_s29 = sphi %s2242_s29, %s2682_s29  }
  0x11   : > { %2640 = sst [smem:[#allocation6_spill]] %s2124_s30  ;;  %s1750_s22 = sadd.s32 4294967294, %s2148_s20  }
  0x12   : > { %2641 = sst [smem:[#allocation7_spill]] %s2128_s15  ;;  %s36_s23 = sadd.s32 1, %s2140_s18 }
  0x13   : > { %2642 = sst [smem:[#allocation8_spill]] %s2132_s16  ;;  %p37_p0 = scmp.ge.s32.totalorder %s36_s23, 2 }
  0x14   : > { %2643 = sst [smem:[#allocation9_spill]] %s2136_s17  ;;  %s39_s24 = sadd.s32 1, %s2144_s19 }
  0x15   : > { %2644 = sst [smem:[#allocation10_spill]] %s2140_s18  ;;  %p420_p1 = scmp.ne.s32.totalorder %s2128_s15, %s2124_s30 }
  0x16   : > { %2645 = sst [smem:[#allocation11_spill]] %s2144_s19  ;;  %p421_p2 = scmp.eq.s32.totalorder %s1749_s21, 3 }
  0x17   : > { %2646 = sst [smem:[#allocation12_spill]] %s2148_s20  ;;  %s2690_s23 = smov (%p37_p0, %s36_s23), 0 }
  0x18   : > { %2647 = sst [smem:[#allocation13_spill]] %s2690_s23  ;;  %s2692_s24 = smov (!%p37_p0, %s39_s24), %s2144_s19 }
  0x19   : > { %p2291_p3 = por %p421_p2, %p420_p1  ;;  %p426_p4 = scmp.ne.s32.totalorder %s2124_s30, %s2120_s29 }
  0x1a   : > { %p41_p5 = scmp.ge.s32.totalorder %s2692_s24, 2  ;;  %p427_p6 = scmp.eq.s32.totalorder %s1750_s22, 3 }
  0x1b   : > { %s2648_s25 = scalar_select %p2291_p3, 1, 0 }
  0x1c   : > { %p1753_p7 = scmp.ge.s32.totalorder %s2148_s20, 1  ;;  %p538_p8 = scmp.lt.s32.totalorder %s2148_s20, 5 }
  0x1d   : > { %2649 = sst [smem:[#allocation14_spill]] %s2648_s25  ;;  %s2694_s24 = smov (%p41_p5, %s2692_s24), 0 }
  0x1e   : > { %2650 = sst [smem:[#allocation15_spill]] %s2694_s24  ;;  %p2301_p9 = por %p427_p6, %p426_p4 }
  0x1f   : > { %p539_p10 = pnand %p1753_p7, %p538_p8  ;;  %s407_s27 = ssub.s32 %s2144_s19, %s2694_s24 }
  0x20   : > { %s2651_s26 = scalar_select %p2301_p9, 1, 0 }
  0x21   : > { %s410_s28 = sadd.s32 1, %s2128_s15  ;;  %p408_p11 = scmp.eq.s32.totalorder %s407_s27, 0 }
  0x22   : > { %2652 = sst [smem:[#allocation16_spill]] %s2651_s26  ;;  %542 = sbr.rel (%p539_p10) target bundleno = 2622 (0xa3e), region = 76 }
  0x23   : > { %s2309_s21 = scalar_select %p408_p11, %s2128_s15, %s410_s28  }
  0x24   : > { %s2617_s22 = sand.u32 (!%p539_p10), 1, %s2124_s30   ;;  %p630_p12 = scmp.lt.s32.totalorder (!%p539_p10), %s2136_s17, 1 }
  0x25   : > { %2653 = sst [smem:[#allocation17_spill]] %s2309_s21  ;;  %s1754_s23 = sshll.u32 (!%p539_p10), %s2617_s22, 3 }
  0x26   : > { %p637_p13 = scmp.lt.s32.totalorder (!%p539_p10), %s2132_s16, 1  ;;  %s2654_s0 = sld [smem:[#allocation18_spill]] (!%p539_p10) }
  0x27   : > { %s2655_s2 = sld [smem:[#allocation19_spill]] (!%p539_p10)  ;;  %s2656_s4 = sld [smem:[#allocation20_spill]] (!%p539_p10) }
  0x28   : > { %s2659_s8 = sld [smem:[#allocation23_spill]] (!%p539_p10)  ;;  %s2661_s20 = sld [smem:[#allocation25_spill]] (!%p539_p10) }
  0x29   : > { %s2317_s18 = scalar_select %p630_p12, %s2136_s17, 1 }
  0x2a   : > { %s2320_s24 = scalar_select %p637_p13, %s2132_s16, 1 }
  0x2b   : > { %s1755_s27 = sshll.u32 %s2317_s18, 3  ;;  %s2382_s12 = scalar_lea.vmem [#allocation2], %s1754_s23 }
  0x2c   : > { %s633_s26 = scalar_lea.vmem %s2654_s0, %s1755_s27  ;;  %s1803_s29 = sshll.u32 %s2320_s24, 4 }
  0x2d   : > { %s641_s25 = scalar_lea.vmem %s2655_s2, %s1803_s29  ;;  %s2341_s10 = scalar_lea.vmem %s2656_s4, %s1803_s29 }
  0x2e   : > { %s2358_s17 = scalar_lea.vmem %s2659_s8, %s1803_s29  ;;  %s666_s16 = scalar_lea.vmem %s2608_s9, %s2320_s24 }
  0x2f   : > { %s1806_s4 = sshll.u32 %s2320_s24, 6  ;;  %s674_s22 = scalar_lea.vmem %s2610_s11, %s2320_s24 }
  0x30   : > { %s2660_s27 = sld [smem:[#allocation24_spill]]  ;;  %s677_s2 = scalar_lea.vmem %s2661_s20, %s2320_s24 }
  0x31   : > { %s2662_s8 = sld [smem:[#allocation26_spill]]  ;;  %s2663_s13 = sld [smem:[#allocation8_spill]] }
  0x36   : > { %s2372_s6 = scalar_lea.vmem %s2660_s27, %s1806_s4 }
  0x37   : > { %s680_s7 = scalar_lea.vmem %s2662_s8, %s2320_s24  ;;  %p1764_p0 = scmp.ne.s32.totalorder %s2663_s13, 0 }
  0x38   : > { %v686_v0 = vld [vmem:[%s633_s26] sm:$0xff] (!%p1764_p0)  ;;  %vm687_vm0 = vcmask (!%p1764_p0), 261120  }
  0x39   : > { %685 = sbr.rel (%p1764_p0) target bundleno = 64 (0x40), region = 80  ;;  %688 = vst.msk [vmem:[%s2382_s12] sm:$0xff] (!%p1764_p0), %vm687_vm0, %v686_v0 }
  0x40 PF: > { %v2020_v1 = vld [vmem:[%s641_s25] sm:$0xff]   ;;  %v2150_v2 = vmov 0.0   ;;  %v2021_v3 = vld [vmem:[%s641_s25 + $0x8] sm:$0xff]   ;;  %vm2151_vm1 = vmmov 0   ;;  %vm715_vm2 = vcmask 261120   ;;  %s2664_s23 = scalar_lea.vmem %s2602_s3, %s2320_s24  ;;  %s2152_s25 = smov 96  }
  0x41   : > { %1841 = vmatprep.subr.bf16.mxu0 %v2150_v2  ;;  %1861 = vmatprep.subr.bf16.mxu1 %v2150_v2  ;;  %v2391_v4 = vld [vmem:[%s2382_s12] sm:$0xff]  ;;  %s2153_s26 = smov 120   ;;  %s2154_s27 = smov 88   ;;  %vm771_vm3 = vcmask 64512   ;;  %vm835_vm4 = vcmask 1043456   ;;  %vm1223_vm5 = vcmask 130048  }
  0x42   : > { %1842 = vmatpush3.bf16.msra.mxu0 %v2020_v1  ;;  %1845 = vmatprep.mubr.msk.bf16.mxu0 %vm2151_vm1, %v2150_v2  ;;  %v691_v5 = vpack.c.bf16 %v2391_v4, %v2391_v4  ;;  %v1765_v6 = vld [vmem:[%s2664_s23] ss:$0 sm:$0xff]  ;;  %s2155_s20 = smov 80   ;;  %s2156_s19 = smov 112   ;;  %vm1225_vm6 = vcmask 195584  }
  0x43   : > { %1843 = vmatprep.subr.bf16.mxu0 %v2150_v2  ;;  %1863 = vmatprep.mubr.msk.bf16.mxu1 %vm2151_vm1, %v2150_v2  ;;  %s2157_s28 = smov 72   ;;  %s2158_s15 = smov 104  }
  0x44   : > { %s2665_s14 = scalar_lea.vmem %s2600_s1, %s2317_s18  ;;  %s2159_s18 = smov 56  }
  0x45   : > { %v1769_v26 = vld [vmem:[%s2665_s14] ss:$0 sm:$0xff]  ;;  %s2160_s29 = smov 64   ;;  %s2161_s30 = smov 40  }
  0x46   : > { %1844 = vmatpush3.bf16.msra.mxu0 %v2021_v3  ;;  %s2162_s13 = smov 48   ;;  %s2163_s4 = smov 8  }
  0x47   : > { %1849 = vmatprep.subr.bf16.mxu0 %v2150_v2  ;;  %s2164_s8 = smov 16   ;;  %s2165_s23 = smov 24  }
  0x48   : > { %s2669_s21 = sld [smem:[#allocation22_spill]] }
  0x49   : > { %1846 = vmatmul.mubr.msk.bf16.vlgmr.msra.gmra.mrb[0].mxu0 %vm715_vm2, %v691_v5 }
  0x4a   : > { %1851 = vmatprep.mubr.msk.bf16.mxu0 %vm2151_vm1, %v2150_v2 }
  0x4e   : > { %s2670_s0 = scalar_lea.vmem %s2669_s21, %s2320_s24 }
 0x11c   : > { %v753_v7 = vpop.f32.mrb[0].mxu0 }
 0x11d   : > { %v754_v8 = vadd.f32 %v1765_v6, %v753_v7  ;;  %v1847_v9 = vpop.f32.mrb[1].mxu0 }
 0x11e   : > { %v756_v10 = vpop.f32.mrb[2].mxu0 }
 0x11f   : > { %v759_v11 = vmul.f32 0.35355338, %v754_v8  ;;  %v2407_v12 = vpack.c.bf16 %v754_v8, %v754_v8  ;;  %v1848_v13 = vpop.f32.mrb[3].mxu0 }
 0x121   : > { %v760_v14 = vpack.c.bf16 %v759_v11, %v759_v11  ;;  %769 = vrot.lane.b32.xlu0 %v2407_v12, %s2152_s25 }
 0x123   : > { %880 = vrot.lane.b32.xlu1 %v760_v14, %s2153_s26  ;;  %s2666_s26 = scalar_lea.vmem %s2604_s5, %s2320_s24 }
 0x125   : > { %882 = vrot.lane.b32.xlu0 %v2407_v12, %s2154_s27 }
 0x127   : > { %992 = vrot.lane.b32.xlu1 %v2407_v12, %s2155_s20  ;;  %s2667_s20 = sld [smem:[#allocation21_spill]] }
 0x129   : > { %990 = vrot.lane.b32.xlu0 %v760_v14, %s2156_s19 }
 0x12b   : > { %1102 = vrot.lane.b32.xlu1 %v2407_v12, %s2157_s28 }
 0x12d   : > { %1100 = vrot.lane.b32.xlu0 %v760_v14, %s2158_s15  ;;  %s2668_s19 = scalar_lea.vmem %s2667_s20, %s2320_s24 }
 0x193   : > { %v770_v15 = vpop.permute.xlu0 %769 }
 0x194   : > { %v776_v16 = vsel %vm771_vm3, %v770_v15, 0 }
 0x195   : > { %1850 = vmatpush3.bf16.xpose.msra.mxu0 %v776_v16  ;;  %v881_v17 = vpop.permute.xlu1 %880 }
 0x196   : > { %1855 = vmatprep.subr.bf16.mxu0 %v2150_v2 }
 0x197   : > { %v883_v18 = vpop.permute.xlu0 %882 }
 0x198   : > { %v888_v19 = vsel %vm771_vm3, %v883_v18, 0 }
 0x199   : > { %1862 = vmatpush3.bf16.xpose.msra.mxu1 %v888_v19  ;;  %v993_v20 = vpop.permute.xlu1 %992 }
 0x19a   : > { %1873 = vmatprep.subr.bf16.mxu1 %v2150_v2  ;;  %v998_v21 = vsel %vm771_vm3, %v993_v20, 0 }
 0x19b   : > { %v991_v23 = vpop.permute.xlu0 %990 }
 0x19c   : > { %1852 = vmatmul.mubr.msk.bf16.vlgmr.msra.gmra.mrb[4].mxu0 %vm771_vm3, %v760_v14 }
 0x19d   : > { %1857 = vmatprep.mubr.msk.bf16.mxu0 %vm2151_vm1, %v2150_v2  ;;  %v1103_v22 = vpop.permute.xlu1 %1102 }
 0x19e   : > { %v1108_v24 = vsel %vm771_vm3, %v1103_v22, 0 }
 0x19f   : > { %v1101_v25 = vpop.permute.xlu0 %1100 }
 0x1a0   : > { %1864 = vmatmul.mubr.msk.bf16.vlgmr.msra.gmra.mrb[0].mxu1 %vm771_vm3, %v881_v17 }
 0x1a1   : > { %1874 = vmatpush3.bf16.xpose.msra.mxu1 %v998_v21  ;;  %1875 = vmatprep.mubr.msk.bf16.mxu1 %vm2151_vm1, %v2150_v2 }
 0x1a2   : > { %1885 = vmatprep.subr.bf16.mxu1 %v2150_v2 }
 0x1a8   : > { %1876 = vmatmul.mubr.msk.bf16.vlgmr.msra.gmra.mrb[4].mxu1 %vm771_vm3, %v991_v23 }
 0x1a9   : > { %1886 = vmatpush3.bf16.xpose.msra.mxu1 %v1108_v24  ;;  %1887 = vmatprep.mubr.msk.bf16.mxu1 %vm2151_vm1, %v2150_v2 }
 0x1aa   : > { %1897 = vmatprep.subr.bf16.mxu1 %v2150_v2 }
 0x1b0   : > { %1888 = vmatmul.mubr.msk.bf16.vlgmr.msra.gmra.mrb[8].mxu1 %vm771_vm3, %v1101_v25 }
 0x1b1   : > { %1901 = vmatprep.mubr.msk.bf16.mxu1 %vm2151_vm1, %v2150_v2 }
 0x26f   : > { %v812_v27 = vpop.f32.mrb[4].mxu0 }
 0x270   : > { %v813_v28 = vadd.f32 %v1769_v26, %v812_v27  ;;  %v1853_v29 = vpop.f32.mrb[5].mxu0 }
 0x271   : > { %v815_v30 = vpop.f32.mrb[6].mxu0 }
 0x272   : > { %v1854_v31 = vpop.f32.mrb[7].mxu0  ;;  %v818_v32 = vsel %vm771_vm3, %v813_v28, -inf }
 0x273   : > { %v924_v33 = vpop.f32.mrb[0].mxu1  ;;  %819 = vmax.xlane.f32.xlu1 %v818_v32 }
 0x274   : > { %v925_v34 = vadd.f32 %v1769_v26, %v924_v33  ;;  %v1865_v35 = vpop.f32.mrb[1].mxu1 }
 0x275   : > { %v927_v36 = vpop.f32.mrb[2].mxu1 }
 0x276   : > { %v1866_v37 = vpop.f32.mrb[3].mxu1  ;;  %v930_v38 = vsel %vm771_vm3, %v925_v34, -inf }
 0x277   : > { %931 = vmax.xlane.f32.xlu0 %v930_v38 }
 0x27b   : > { %v1034_v39 = vpop.f32.mrb[4].mxu1 }
 0x27c   : > { %v1035_v40 = vadd.f32 %v1769_v26, %v1034_v39  ;;  %v1877_v41 = vpop.f32.mrb[5].mxu1 }
 0x27d   : > { %v1037_v42 = vpop.f32.mrb[6].mxu1  ;;  %v2022_v41 = vld [vmem:[%s2341_s10] sm:$0xff]  }
 0x27e   : > { %v1878_v43 = vpop.f32.mrb[7].mxu1  ;;  %v1040_v44 = vsel %vm771_vm3, %v1035_v40, -inf  ;;  %1898 = vmatpush3.bf16.msra.mxu1 %v2022_v41  ;;  %v2023_v42 = vld [vmem:[%s2341_s10 + $0x8] sm:$0xff]  }
 0x27f   : > { %1041 = vmax.xlane.f32.xlu0 %v1040_v44  ;;  %1899 = vmatprep.subr.bf16.mxu1 %v2150_v2 }
 0x282   : > { %1900 = vmatpush3.bf16.msra.mxu1 %v2023_v42 }
 0x283   : > { %v1144_v45 = vpop.f32.mrb[8].mxu1  ;;  %1913 = vmatprep.subr.bf16.mxu1 %v2150_v2 }
 0x284   : > { %v1145_v46 = vadd.f32 %v1769_v26, %v1144_v45  ;;  %v1889_v47 = vpop.f32.mrb[9].mxu1 }
 0x285   : > { %v1147_v48 = vpop.f32.mrb[10].mxu1 }
 0x286   : > { %v1890_v49 = vpop.f32.mrb[11].mxu1  ;;  %v1150_v50 = vsel %vm771_vm3, %v1145_v46, -inf }
 0x287   : > { %1151 = vmax.xlane.f32.xlu1 %v1150_v50 }
 0x300   : > { %v820_v51 = vpop.xlane.xlu1 %819 }
 0x301   : > { %v821_v52 = vsub.f32 %v813_v28, %v820_v51 }
 0x303   : > { %v822_v53 = vmul.f32 1.442695, %v821_v52 }
 0x304   : > { %v932_v54 = vpop.xlane.xlu0 %931 }
 0x305   : > { %2034 = vpow2.f32 %v822_v53  ;;  %v933_v55 = vsub.f32 %v925_v34, %v932_v54 }
 0x307   : > { %v934_v56 = vmul.f32 1.442695, %v933_v55 }
 0x309   : > { %2036 = vpow2.f32 %v934_v56 }
 0x30c   : > { %v1042_v57 = vpop.xlane.xlu0 %1041 }
 0x30d   : > { %v1043_v58 = vsub.f32 %v1035_v40, %v1042_v57 }
 0x30f   : > { %v2035_v59 = vpop.eup %2034  ;;  %v1044_v60 = vmul.f32 1.442695, %v1043_v58  ;;  %v1778_v58 = vld [vmem:[%s2666_s26] ss:$0 sm:$0xff] }
 0x310   : > { %v824_v61 = vsel %vm771_vm3, %v2035_v59, 0.0 }
 0x311   : > { %2038 = vpow2.f32 %v1044_v60  ;;  %825 = vadd.xlane.f32.xlu0 %v824_v61 }
 0x313   : > { %v2037_v62 = vpop.eup %2036 }
 0x314   : > { %v936_v63 = vsel %vm771_vm3, %v2037_v62, 0.0  ;;  %v1152_v3 = vpop.xlane.xlu1 %1151 }
 0x315   : > { %937 = vadd.xlane.f32.xlu1 %v936_v63  ;;  %v1153_v5 = vsub.f32 %v1145_v46, %v1152_v3 }
 0x317   : > { %v1154_v6 = vmul.f32 1.442695, %v1153_v5 }
 0x319   : > { %2040 = vpow2.f32 %v1154_v6 }
 0x31b   : > { %v2039_v0 = vpop.eup %2038 }
 0x31c   : > { %v1046_v1 = vsel %vm771_vm3, %v2039_v0, 0.0 }
 0x31d   : > { %1047 = vadd.xlane.f32.xlu0 %v1046_v1 }
 0x323   : > { %v2041_v7 = vpop.eup %2040 }
 0x324   : > { %v1156_v8 = vsel %vm771_vm3, %v2041_v7, 0.0 }
 0x326   : > { %942 = vrot.lane.b32.xlu1 %v2407_v12, %s2159_s18 }
 0x333   : > { %830 = vrot.lane.b32.xlu0 %v2407_v12, %s2160_s29 }
 0x337   : > { %1162 = vrot.lane.b32.xlu0 %v2407_v12, %s2161_s30 }
 0x34a   : > { %1157 = vadd.xlane.f32.xlu1 %v1156_v8 }
 0x35b   : > { %1052 = vrot.lane.b32.xlu1 %v2407_v12, %s2162_s13 }
 0x39e   : > { %v826_v9 = vpop.xlane.xlu0 %825 }
 0x39f   : > { %2042 = vrcp.f32 %v826_v9  ;;  %v2024_v9 = vld [vmem:[%s2358_s17] sm:$0xff]  }
 0x3a2   : > { %v938_v10 = vpop.xlane.xlu1 %937 }
 0x3a3   : > { %2044 = vrcp.f32 %v938_v10  ;;  %v2025_v10 = vld [vmem:[%s2358_s17 + $0x8] sm:$0xff]   ;;  %s1550_s17 = sshll.u32 %s2382_s12, 4  ;;  %s2544_s17 = int_to_ptr.vmem [resolvable:$true] %s1550_s17 }
 0x3a4   : > { %s2054_s24 = scalar_lea.vmem %s2544_s17, 128 }
 0x3a5   : > { %p2055_p1 = scmp.ne.s32.totalorder %s2544_s17, %s2054_s24 }
 0x3a6   : > { %v943_v17 = vpop.permute.xlu1 %942 }
 0x3a7   : > { %v948_v20 = vsel %vm835_vm4, %v943_v17, 0  ;;  %p2056_p2 = pnand %p2055_p1, %p2291_p3 }
 0x3a9   : > { %v2043_v11 = vpop.eup %2042  ;;  %p2057_p4 = pneg %p2056_p2 }
 0x3aa   : > { %v1048_v13 = vpop.xlane.xlu0 %1047  ;;  %v828_v14 = vmul.f32 %v2043_v11, %v2035_v59  ;;  %v2027_v11 = vld [vmem:[%s2372_s6 + $0x8] sm:$0xff]  }
 0x3ab   : > { %2046 = vrcp.f32 %v1048_v13  ;;  %v2028_v13 = vld [vmem:[%s2372_s6 + $0x10] sm:$0xff]  }
 0x3ac   : > { %v829_v18 = vpack.c.bf16 %v828_v14, %v828_v14  ;;  %v2029_v14 = vld [vmem:[%s2372_s6 + $0x18] sm:$0xff]  }
 0x3ad   : > { %v2045_v19 = vpop.eup %2044 }
 0x3ae   : > { %v831_v15 = vpop.permute.xlu0 %830  ;;  %v940_v12 = vmul.f32 %v2045_v19, %v2037_v62 }
 0x3af   : > { %v837_v16 = vsel %vm835_vm4, %v831_v15, 0  ;;  %v2030_v15 = vld [vmem:[%s2372_s6 + $0x20] sm:$0xff]  }
 0x3b0   : > { %1856 = vmatpush3.bf16.msra.mxu0 %v837_v16  ;;  %v941_v21 = vpack.c.bf16 %v940_v12, %v940_v12  ;;  %v2031_v16 = vld [vmem:[%s2372_s6 + $0x28] sm:$0xff]   ;;  %v1782_v12 = vld [vmem:[%s2668_s19] ss:$0 sm:$0xff]  ;;  %s2676_s19 = sld [smem:[#allocation27_spill]] }
 0x3b1   : > { %1867 = vmatprep.subr.bf16.mxu0 %v2150_v2 }
 0x3b2   : > { %v1163_v27 = vpop.permute.xlu0 %1162 }
 0x3b3   : > { %1858 = vmatmul.mubr.msk.bf16.vlgmr.msra.gmra.mrb[8].mxu0 %vm771_vm3, %v829_v18  ;;  %v1168_v29 = vsel %vm835_vm4, %v1163_v27, 0  ;;  %v2033_v27 = vld [vmem:[%s2372_s6 + $0x38] sm:$0xff]  }
 0x3b4   : > { %1868 = vmatpush3.bf16.msra.mxu0 %v948_v20  ;;  %1869 = vmatprep.mubr.msk.bf16.mxu0 %vm2151_vm1, %v2150_v2 }
 0x3b5   : > { %1879 = vmatprep.subr.bf16.mxu0 %v2150_v2  ;;  %v2047_v22 = vpop.eup %2046 }
 0x3b6   : > { %v1050_v24 = vmul.f32 %v2047_v22, %v2039_v0  ;;  %v1783_v22 = vld [vmem:[%s2670_s0] ss:$0 sm:$0xff]  ;;  %s2677_s28 = smov %s2676_s19 }
 0x3b8   : > { %v1051_v28 = vpack.c.bf16 %v1050_v24, %v1050_v24 }
 0x3bb   : > { %1870 = vmatmul.mubr.msk.bf16.vlgmr.msra.gmra.mrb[12].mxu0 %vm771_vm3, %v941_v21 }
 0x3bc   : > { %1881 = vmatprep.mubr.msk.bf16.mxu0 %vm2151_vm1, %v2150_v2 }
 0x3d7   : > { %v1158_v23 = vpop.xlane.xlu1 %1157 }
 0x3d8   : > { %2048 = vrcp.f32 %v1158_v23 }
 0x3db   : > { %v1053_v25 = vpop.permute.xlu1 %1052 }
 0x3dc   : > { %v1058_v26 = vsel %vm835_vm4, %v1053_v25, 0 }
 0x3dd   : > { %1880 = vmatpush3.bf16.msra.mxu0 %v1058_v26  ;;  %v2032_v26 = vld [vmem:[%s2372_s6 + $0x30] sm:$0xff]  }
 0x3de   : > { %1891 = vmatprep.subr.bf16.mxu0 %v2150_v2 }
 0x3e0   : > { %1882 = vmatmul.mubr.msk.bf16.vlgmr.msra.gmra.mrb[16].mxu0 %vm771_vm3, %v1051_v28  ;;  %v1784_v28 = vld [vmem:[%s666_s16] ss:$0 sm:$0xff]  ;;  %s2672_s16 = sld [smem:[#allocation6_spill]] }
 0x3e1   : > { %1892 = vmatpush3.bf16.msra.mxu0 %v1168_v29  ;;  %1893 = vmatprep.mubr.msk.bf16.mxu0 %vm2151_vm1, %v2150_v2 }
 0x3e2   : > { %v2049_v30 = vpop.eup %2048  ;;  %1905 = vmatprep.subr.bf16.mxu0 %v2150_v2 }
 0x3e3   : > { %v1160_v31 = vmul.f32 %v2049_v30, %v2041_v7 }
 0x3e5   : > { %v1161_v32 = vpack.c.bf16 %v1160_v31, %v1160_v31 }
 0x3e8   : > { %1894 = vmatmul.mubr.msk.bf16.vlgmr.msra.gmra.mrb[20].mxu0 %vm771_vm3, %v1161_v32 }
 0x3e9   : > { %1909 = vmatprep.mubr.msk.bf16.mxu0 %vm2151_vm1, %v2150_v2  ;;  %1906 = vmatpush3.bf16.msra.mxu0 %v2024_v9 }
 0x3ea   : > { %1907 = vmatprep.subr.bf16.mxu0 %v2150_v2 }
 0x3ed   : > { %1908 = vmatpush3.bf16.msra.mxu0 %v2025_v10 }
 0x486   : > { %v873_v33 = vpop.f32.mrb[8].mxu0 }
 0x487   : > { %v1859_v34 = vpop.f32.mrb[9].mxu0 }
 0x488   : > { %v876_v35 = vpop.f32.mrb[10].mxu0 }
 0x489   : > { %v1860_v36 = vpop.f32.mrb[11].mxu0 }
 0x48e   : > { %v984_v37 = vpop.f32.mrb[12].mxu0 }
 0x48f   : > { %1211 = vrot.lane.b32.xlu1 %v984_v37, %s2163_s4  ;;  %v1871_v38 = vpop.f32.mrb[13].mxu0 }
 0x490   : > { %v987_v39 = vpop.f32.mrb[14].mxu0 }
 0x491   : > { %v1872_v40 = vpop.f32.mrb[15].mxu0 }
 0x4b3   : > { %v1094_v43 = vpop.f32.mrb[16].mxu0 }
 0x4b4   : > { %1215 = vrot.lane.b32.xlu0 %v1094_v43, %s2164_s8  ;;  %v1883_v44 = vpop.f32.mrb[17].mxu0 }
 0x4b5   : > { %v1097_v45 = vpop.f32.mrb[18].mxu0 }
 0x4b6   : > { %v1884_v46 = vpop.f32.mrb[19].mxu0 }
 0x4bb   : > { %v1204_v47 = vpop.f32.mrb[20].mxu0 }
 0x4bc   : > { %1219 = vrot.lane.b32.xlu1 %v1204_v47, %s2165_s23  ;;  %v1895_v48 = vpop.f32.mrb[21].mxu0 }
 0x4bd   : > { %v1207_v49 = vpop.f32.mrb[22].mxu0 }
 0x4be   : > { %v1896_v50 = vpop.f32.mrb[23].mxu0 }
 0x501   : > { %v1212_v51 = vpop.permute.xlu1 %1211 }
 0x502   : > { %v1222_v53 = vsel %vm771_vm3, %v873_v33, %v1212_v51 }
 0x526   : > { %v1216_v52 = vpop.permute.xlu0 %1215 }
 0x527   : > { %v1224_v54 = vsel %vm1223_vm5, %v1222_v53, %v1216_v52  ;;  %v1797_v52 = vld [vmem:[%s677_s2] ss:$0 sm:$0xff]  ;;  %s2678_s2 = sand.u32 1, %s2672_s16  }
 0x528   : > { %s1537_s21 = scalar_lea.sflag [#allocation3], %s2678_s2 }
 0x52e   : > { %v1220_v55 = vpop.permute.xlu1 %1219 }
 0x52f   : > { %v1226_v56 = vsel %vm1225_vm6, %v1224_v54, %v1220_v55  ;;  %v1798_v54 = vld [vmem:[%s680_s7] ss:$0 sm:$0xff]  ;;  %s2166_s7 = smov [#allocation2]  }
 0x530   : > { %v1227_v57 = vpack.c.bf16 %v1226_v56, %v1226_v56  ;;  %s2058_s0 = sshll.u32 %s2166_s7, 4  ;;  %s2059_s0 = int_to_ptr.vmem [resolvable:$false] %s2058_s0 }
 0x531   : > { %s2060_s14 = scalar_lea.vmem %s2059_s0, 256  ;;  %p2061_p5 = scmp.lt.s32.totalorder %s2544_s17, %s2059_s0 }
 0x532   : > { %1902 = vmatmul.mubr.msk.bf16.vlgmr.msra.gmra.mrb[12].mxu1 %vm715_vm2, %v1227_v57  ;;  %p2062_p6 = scmp.lt.s32.totalorder %s2060_s14, %s2054_s24 }
 0x533   : > { %1929 = vmatprep.mubr.msk.bf16.mxu1 %vm2151_vm1, %v2150_v2 }
 0x534   : > { %p2063_p7 = por %p2062_p6, %p2061_p5 }
 0x536   : > { %p2064_p8 = pnand %p2063_p7, %p2057_p4 }
 0x605   : > { %v1288_v59 = vpop.f32.mrb[12].mxu1 }
 0x606   : > { %v1289_v60 = vadd.f32 %v1778_v58, %v1288_v59  ;;  %v1903_v61 = vpop.f32.mrb[13].mxu1 }
 0x607   : > { %v1291_v62 = vpop.f32.mrb[14].mxu1 }
 0x608   : > { %v1904_v63 = vpop.f32.mrb[15].mxu1  ;;  %v1294_v0 = vadd.f32 %v1289_v60, %v2391_v4  ;;  %v2026_v4 = vld [vmem:[%s2372_s6] sm:$0xff]   ;;  %s2671_s6 = sld [smem:[#allocation9_spill]] }
 0x609   : > { %1914 = vmatpush3.bf16.msra.mxu1 %v2026_v4 }
 0x60a   : > { %v1297_v1 = vsel %vm715_vm2, %v1294_v0, 0.0  ;;  %1915 = vmatprep.subr.bf16.mxu1 %v2150_v2 }
 0x60b   : > { %1298 = vadd.xlane.f32.xlu0 %v1297_v1 }
 0x60d   : > { %1916 = vmatpush3.bf16.msra.mxu1 %v2027_v11 }
 0x60e   : > { %1917 = vmatprep.subr.bf16.mxu1 %v2150_v2  ;;  %s1800_s26 = sshll.u32 %s2671_s6, 7 }
 0x60f   : > { %s2542_s15 = scalar_lea.hbm %s2676_s19, %s1800_s26 }
 0x611   : > { %1918 = vmatpush3.bf16.msra.mxu1 %v2028_v13 }
 0x612   : > { %1919 = vmatprep.subr.bf16.mxu1 %v2150_v2 }
 0x615   : > { %1920 = vmatpush3.bf16.msra.mxu1 %v2029_v14 }
 0x616   : > { %1921 = vmatprep.subr.bf16.mxu1 %v2150_v2 }
 0x619   : > { %1922 = vmatpush3.bf16.msra.mxu1 %v2030_v15 }
 0x61a   : > { %1923 = vmatprep.subr.bf16.mxu1 %v2150_v2 }
 0x61d   : > { %1924 = vmatpush3.bf16.msra.mxu1 %v2031_v16 }
 0x61e   : > { %1925 = vmatprep.subr.bf16.mxu1 %v2150_v2 }
 0x621   : > { %1926 = vmatpush3.bf16.msra.mxu1 %v2032_v26 }
 0x622   : > { %1927 = vmatprep.subr.bf16.mxu1 %v2150_v2  ;;  %v1788_v2 = vld [vmem:[%s674_s22] ss:$0 sm:$0xff] }
 0x625   : > { %1928 = vmatpush3.bf16.msra.mxu1 %v2033_v27 }
 0x698   : > { %v1299_v3 = vpop.xlane.xlu0 %1298 }
 0x699   : > { %v1301_v5 = vmul.f32 0.03125, %v1299_v3 }
 0x69b   : > { %v1302_v6 = vsub.f32 %v1294_v0, %v1301_v5 }
 0x69d   : > { %v1303_v7 = vmul.f32 %v1302_v6, %v1302_v6 }
 0x69f   : > { %v1304_v8 = vsel %vm715_vm2, %v1303_v7, 0.0 }
 0x6a0   : > { %1305 = vadd.xlane.f32.xlu1 %v1304_v8 }
 0x72d   : > { %v1306_v17 = vpop.xlane.xlu1 %1305 }
 0x72e   : > { %v1307_v18 = vmul.f32 0.03125, %v1306_v17 }
 0x730   : > { %v1308_v19 = vadd.f32 1e-05, %v1307_v18 }
 0x732   : > { %2050 = vrsqrt.f32 %v1308_v19 }
 0x73c   : > { %v2051_v20 = vpop.eup %2050 }
 0x73d   : > { %v1310_v21 = vmul.f32 %v2051_v20, %v1302_v6 }
 0x73f   : > { %v1317_v23 = vmul.f32 %v1782_v12, %v1310_v21 }
 0x741   : > { %v1324_v24 = vadd.f32 %v1783_v22, %v1317_v23 }
 0x743   : > { %v1325_v25 = vpack.c.bf16 %v1324_v24, %v1324_v24 }
 0x745   : > { %1910 = vmatmul.mubr.msk.bf16.vlgmr.msra.gmra.mrb[24].mxu0 %vm715_vm2, %v1325_v25 }
 0x818   : > { %v1386_v29 = vpop.f32.mrb[24].mxu0 }
 0x819   : > { %v1387_v30 = vadd.f32 %v1784_v28, %v1386_v29  ;;  %v1911_v31 = vpop.f32.mrb[25].mxu0 }
 0x81a   : > { %v1389_v32 = vpop.f32.mrb[26].mxu0 }
 0x81b   : > { %v1392_v33 = vmax.f32 %v1387_v30, 0.0  ;;  %v1912_v34 = vpop.f32.mrb[27].mxu0 }
 0x81d   : > { %v1393_v35 = vpack.c.bf16 %v1392_v33, %v1392_v33 }
 0x81f   : > { %1930 = vmatmul.mubr.bf16.vlgmr.msra.gmra.mrb[16].mxu1 %v1393_v35 }
 0x8f2   : > { %v1499_v36 = vpop.f32.mrb[16].mxu1 }
 0x8f3   : > { %v1500_v37 = vadd.f32 %v1788_v2, %v1499_v36  ;;  %v1931_v38 = vpop.f32.mrb[17].mxu1 }
 0x8f4   : > { %v1502_v39 = vpop.f32.mrb[18].mxu1 }
 0x8f5   : > { %v1932_v40 = vpop.f32.mrb[19].mxu1  ;;  %v1505_v41 = vadd.f32 %v1500_v37, %v1324_v24 }
 0x8f7   : > { %v1508_v42 = vsel %vm715_vm2, %v1505_v41, 0.0 }
 0x8f8   : > { %1509 = vadd.xlane.f32.xlu0 %v1508_v42 }
 0x985   : > { %v1510_v43 = vpop.xlane.xlu0 %1509 }
 0x986   : > { %v1511_v44 = vmul.f32 0.03125, %v1510_v43 }
 0x988   : > { %v1512_v45 = vsub.f32 %v1505_v41, %v1511_v44 }
 0x98a   : > { %v1513_v46 = vmul.f32 %v1512_v45, %v1512_v45 }
 0x98c   : > { %v1514_v47 = vsel %vm715_vm2, %v1513_v46, 0.0 }
 0x98d   : > { %1515 = vadd.xlane.f32.xlu0 %v1514_v47 }
 0xa1a   : > { %v1516_v48 = vpop.xlane.xlu0 %1515 }
 0xa1b   : > { %v1517_v49 = vmul.f32 0.03125, %v1516_v48 }
 0xa1d   : > { %v1518_v50 = vadd.f32 1e-05, %v1517_v49 }
 0xa1f   : > { %2052 = vrsqrt.f32 %v1518_v50 }
 0xa29   : > { %v2053_v51 = vpop.eup %2052 }
 0xa2a   : > { %v1520_v53 = vmul.f32 %v2053_v51, %v1512_v45 }
 0xa2c   : > { %v1527_v55 = vmul.f32 %v1797_v52, %v1520_v53 }
 0xa2e   : > { %v1534_v56 = vadd.f32 %v1798_v54, %v1527_v55 }
 0xa30   : > { %1535 = vst.msk [vmem:[%s2382_s12] sm:$0xff] %vm715_vm2, %v1534_v56 }
 0xa31   : > { %2067 = shalt.err (!%p2064_p8)
}
 0xa32   : > { %s2068_s12 = scalar_lea.hbm %s2542_s15, 128  ;;  %s2072_s30 = scalar_lea.hbm %s2677_s28, 256 }
 0xa33   : > { %p2069_p10 = scmp.ne.s32.totalorder %s2542_s15, %s2068_s12  ;;  %p2073_p13 = scmp.lt.u32.totalorder %s2542_s15, %s2677_s28 }
 0xa34   : > { %p2074_p0 = scmp.lt.u32.totalorder %s2072_s30, %s2068_s12  ;;  %p2076_p2 = scmp.lt.u32.totalorder %s2068_s12, %s2542_s15 }
 0xa35   : > { %p2070_p11 = pnand %p2069_p10, %p2291_p3 }
 0xa36   : > { %p2075_p1 = por %p2074_p0, %p2073_p13 }
 0xa37   : > { %p2071_p12 = pneg %p2070_p11 }
 0xa38   : > { %p2077_p4 = por %p2076_p2, %p2075_p1 }
 0xa3a   : > { %p2078_p5 = pnand %p2077_p4, %p2071_p12 }
 0xa3c   : > { %2081 = shalt.err (!%p2078_p5)
}
 0xa3d   : > { %1933 = dma.vmem_to_hbm [thread:$0]  (%p2291_p3), %s2544_s17, 128, %s2542_s15, %s1537_s21  }
 0xa3e PF: > { %s2679_s13 = sld [smem:[#allocation12_spill]]  ;;  %s2680_s4 = sld [smem:[#allocation5_spill]] }
 0xa44   : > { %p1939_p6 = scmp.ge.s32.totalorder %s2679_s13, 2  ;;  %s1562_s23 = sand.u32 1, %s2680_s4  }
 0xa45   : > { %s1563_s10 = scalar_lea.sflag [#allocation3], %s1562_s23 }
 0xa46   : > { %p1936_p7 = pnand %p1939_p6, %p2301_p9 }
 0xa48   : > { %2115 = dma.done.wait (!%p1936_p7), %s1563_s10, 128  }
 0xa49   : > { %2117 = vsyncadd (!%p1936_p7), %s1563_s10, 4294967168  ;;  %s27_s20 = sadd.s32 1, %s2679_s13   ;;  %s2682_s29 = sld [smem:[#allocation6_spill]] }
 0xa4a   : > { %p24_p8 = scmp.ge.s32.totalorder %s27_s20, 6   ;;  %s2683_s30 = sld [smem:[#allocation7_spill]] }
 0xa4b   : > { %s2684_s15 = sld [smem:[#allocation17_spill]]  ;;  %s2685_s16 = sld [smem:[#allocation10_spill]] }
 0xa4c   : > { %s2686_s17 = sld [smem:[#allocation11_spill]]  ;;  %s2687_s18 = sld [smem:[#allocation13_spill]] }
 0xa4d   : > { %s2688_s19 = sld [smem:[#allocation15_spill]]  ;;  %26 = sbr.rel (!%p24_p8) target bundleno = 16 (0x10), region = 154 }
 0xa54   :  { %1568 = vsyncpa [#allocation3], 1 }
 0xa55   :  { %1570 = vsyncpa [#allocation3 + $0x1], 1 }

</bundles_post_ra>
